<compile_context>
chip_gen: v7x
topology: tpu7x:2x2x1
jax: 0.10.0
libtpu: 0.0.40
codegen_flags: <defaults>
</compile_context>

<pallas_src>
import jax
import jax.numpy as jnp
from jax.experimental import pallas as pl
from jax.experimental.pallas import tpu as pltpu


def _cdiv(a: int, b: int) -> int:
    return -(-a // b)


def _round_up(a: int, b: int) -> int:
    return _cdiv(a, b) * b


def _round_down(a: int, b: int) -> int:
    return (a // b) * b


def _vmem_limit_bytes() -> int:
    """Generation-aware scoped-VMEM limit for this kernel's tiles."""
    try:
        cap = pltpu.get_tpu_info().vmem_capacity_bytes
    except Exception:
        cap = 64 * 1024 * 1024  # conservative: v7x per-TC physical VMEM
    # v5e/v6e (128 MiB physical) -> 64 MiB scratch; v7x (64 MiB) -> 32 MiB.
    return min(64 * 1024 * 1024, cap // 2)


def _chomp_kernel(x_ref, o_ref):
    # x_ref: (TM, read_cols)   read_cols >= o_ref.shape[-1]
    # o_ref: (TM, out_cols)
    # Static prefix slice of the lane axis (a full slice in the lane-tiled
    # path, where both blocks have identical shape). The chomped / padded
    # tail lanes of x_ref are never written to the output.
    o_ref[...] = x_ref[:, : o_ref.shape[-1]]


def chomp1d(x: jax.Array, chomp_size: int) -> jax.Array:
    """Pallas equivalent of Chomp1d(chomp_size)(x) for x of shape (N, C, L)."""
    n, c, l = x.shape
    if chomp_size == 0:
        # Literal PyTorch semantics: x[:, :, :-0] == x[:, :, :0] (empty tail).
        return x[:, :, :0]
    assert 0 < chomp_size < l, "chomp_size must be in [0, L)"
    l_out = l - chomp_size

    rows = n * c
    # Free reshape: (N, C, L) is row-major contiguous -> (N*C, L).
    x2d = x.reshape(rows, l)

    itemsize = jnp.dtype(x.dtype).itemsize
    # Sublane packing granularity: 8 (f32), 16 (bf16/f16), 32 (int8/fp8).
    sub = max(8, 32 // itemsize)

    vmem_limit = _vmem_limit_bytes()
    vmem_budget = (vmem_limit * 3) // 4

    # Trim the HBM read to within <128 columns of the kept prefix whenever the
    # trimmed window still fits inside L (128-multiple lane blocks are legal).
    l_in_trim = _round_up(l_out, 128)
    l_in_block = l_in_trim if l_in_trim <= l else l

    # Double-buffered bytes per row of tile: 2 * (input block + output block).
    bytes_per_row = 2 * (l_in_block + l_out) * itemsize

    MIN_STEPS = 4  # keep several grid steps for pipelining / v7x megacore

    if sub * bytes_per_row <= vmem_budget:
        # ---- Path A: full-width rows, tile only the (flattened) row axis. ----
        tm = (vmem_budget // bytes_per_row) // sub * sub
        tm = min(tm, 1024)  # diminishing returns past ~512-1024 rows
        # Cap so the grid keeps >= MIN_STEPS iterations when rows allow it.
        tm = min(tm, _round_up(_cdiv(rows, MIN_STEPS), sub))
        if tm >= rows:
            tm = rows  # full-dim block (always legal) for small inputs
        grid = (_cdiv(rows, tm),)
        in_specs = [pl.BlockSpec((tm, l_in_block), lambda i: (i, 0))]
        out_specs = pl.BlockSpec((tm, l_out), lambda i: (i, 0))
        semantics = ("parallel",)
        read_cols = l_in_block
    else:
        # ---- Path B: rows too long for a full-width tile -> lane-tile too. ----
        tm = sub if rows > sub else rows
        tl = _round_down(vmem_budget // (4 * max(tm, 1) * itemsize), 128)
        tl = max(128, min(tl, _round_up(l_out, 128)))
        grid = (_cdiv(rows, tm), _cdiv(l_out, tl))
        # Chomp only drops the tail, so column offsets are identical in input
        # and output; edge blocks past l_out are masked on store by Pallas.
        in_specs = [pl.BlockSpec((tm, tl), lambda i, j: (i, j))]
        out_specs = pl.BlockSpec((tm, tl), lambda i, j: (i, j))
        semantics = ("parallel", "parallel")
        read_cols = l_out

    out2d = pl.pallas_call(
        _chomp_kernel,
        out_shape=jax.ShapeDtypeStruct((rows, l_out), x.dtype),
        grid_spec=pltpu.PrefetchScalarGridSpec(
            num_scalar_prefetch=0,
            grid=grid,
            in_specs=in_specs,
            out_specs=out_specs,
        ),
        compiler_params=pltpu.CompilerParams(
            dimension_semantics=semantics,
            vmem_limit_bytes=vmem_limit,
        ),
        cost_estimate=pl.CostEstimate(
            flops=0,
            transcendentals=0,
            bytes_accessed=rows * (read_cols + l_out) * itemsize,
        ),
    )(x2d)

    return out2d.reshape(n, c, l_out)


if __name__ == "__main__":
    key = jax.random.PRNGKey(0)
    N, C, L = 2, 4, 16
    chomp_size = 3  # Chomp1d(3)

    x = jax.random.normal(key, (N, C, L), dtype=jnp.float32)

    out = chomp1d(x, chomp_size)
    out = jax.block_until_ready(out)

    # Reference check: pure-JAX slice (same semantics as the PyTorch module).
    ref = x[:, :, :-chomp_size]
    assert out.shape == (N, C, L - chomp_size), out.shape
    assert jnp.array_equal(out, ref), "mismatch vs reference slice"

    print("KERNEL_OK")
</pallas_src>

<mosaic_0001>
module attributes {stable_mosaic.version = 11 : i64} {
  func.func @_chomp_kernel(%arg0: i32, %arg1: memref<8x16xf32, #tpu.memory_space<vmem>>, %arg2: memref<8x13xf32, #tpu.memory_space<vmem>>) attributes {dimension_semantics = [#tpu.dimension_semantics<parallel>], iteration_bounds = array<i64: 1>, scalar_prefetch = 0 : i64, scratch_operands = 0 : i64, tpu.core_type = #tpu.core_type<tc>, window_params = [{transform_indices = @transform_0, window_bounds = array<i64: 8, 16>}, {transform_indices = @transform_1, window_bounds = array<i64: 8, 13>}]} {
    %c0 = arith.constant 0 : index
    %c0_0 = arith.constant 0 : index
    %0 = vector.load %arg1[%c0, %c0_0] : memref<8x16xf32, #tpu.memory_space<vmem>>, vector<8x13xf32>
    %c0_1 = arith.constant 0 : index
    %c0_2 = arith.constant 0 : index
    %1 = vector.load %arg2[%c0_1, %c0_2] : memref<8x13xf32, #tpu.memory_space<vmem>>, vector<8x13xf32>
    tpu.vector_store %arg2[%c0_1, %c0_2], %0 {strides = array<i32>} : memref<8x13xf32, #tpu.memory_space<vmem>>, vector<8x13xf32>,
    return
  }
  func.func @transform_0(%arg0: i32) -> (i32, i32) {
    %c0_i32 = arith.constant 0 : i32
    %c0_i32_0 = arith.constant 0 : i32
    return %arg0, %c0_i32 : i32, i32
  }
  func.func @transform_1(%arg0: i32) -> (i32, i32) {
    %c0_i32 = arith.constant 0 : i32
    %c0_i32_0 = arith.constant 0 : i32
    return %arg0, %c0_i32 : i32, i32
  }
}

</mosaic_0001>

<bundles_post_ra>
// kernel: tpu_custom_call.1
= control target key start
LH: loop header
LB: loop body
LE: loop exit
PB: predicated region body
PF: predicated region fallthrough
CT: control target
= control target key end

     0   :  { %6 = vsyncpa [#allocation3], 0  ;;  %s125_s0 = inlined_call_operand.hbm [shape: f32[8,16], index: 0, kind: input, shape index: {}]   ;;  %s126_s1 = inlined_call_operand.hbm [shape: f32[8,13], index: 1, kind: output, shape index: {}]  }
   0x1   :  { %7 = vsyncpa [#allocation4], 0  ;;  %s89_s6 = smov [#allocation2]   ;;  %s41_s10 = scalar_lea.hbm %s125_s0, 128 }
   0x2   :  { %s14_s7 = sshll.u32 %s89_s6, 4  ;;  %p42_p0 = scmp.ne.s32.totalorder %s125_s0, %s41_s10  ;;  %s15_s7 = int_to_ptr.vmem [resolvable:$true] %s14_s7 }
   0x3   :  { %p45_p1 = scmp.lt.u32.totalorder %s41_s10, %s125_s0 }
   0x5   :  { %p47_p2 = pnand %p45_p1, %p42_p0 }
   0x7   :  { %50 = shalt.err (!%p47_p2)
}
   0x8   :  { %s51_s15 = scalar_lea.vmem %s15_s7, 128  ;;  %p56_p4 = scmp.lt.s32.totalorder %s15_s7, %s15_s7 }
   0x9   :  { %p52_p3 = scmp.ne.s32.totalorder %s15_s7, %s51_s15  ;;  %p57_p5 = scmp.lt.s32.totalorder %s51_s15, %s51_s15 }
   0xb   :  { %p58_p6 = por %p57_p5, %p56_p4 }
   0xd   :  { %p59_p7 = pnand %p58_p6, %p52_p3 }
   0xf   :  { %62 = shalt.err (!%p59_p7)
}
  0x10   :  { %17 = dma.hbm_to_vmem [thread:$0]  %s125_s0, 128, %s15_s7, [#allocation3]  }
  0x11   :  { %85 = dma.done.wait [#allocation3], 128  }
  0x12   :  { %86 = vsyncadd [#allocation3], 4294967168  ;;  %s90_s18 = smov [#allocation5]   ;;  %vm22_vm0 = vcmask 105472   ;;  %v21_v0 = vld [vmem:[#allocation2] sm:$0xff] }
  0x13   :  { %s30_s19 = sshll.u32 %s90_s18, 4  ;;  %23 = vst.msk [vmem:[#allocation5] sm:$0xff] %vm22_vm0, %v21_v0  ;;  %s31_s19 = int_to_ptr.vmem [resolvable:$true] %s30_s19 }
  0x14   :  { %s63_s20 = scalar_lea.vmem %s31_s19, 128  ;;  %p68_p9 = scmp.lt.s32.totalorder %s31_s19, %s31_s19 }
  0x15   :  { %p64_p8 = scmp.ne.s32.totalorder %s31_s19, %s63_s20  ;;  %p69_p10 = scmp.lt.s32.totalorder %s63_s20, %s63_s20 }
  0x17   :  { %p70_p11 = por %p69_p10, %p68_p9 }
  0x19   :  { %p71_p12 = pnand %p70_p11, %p64_p8 }
  0x1b   :  { %74 = shalt.err (!%p71_p12)
}
  0x1c   :  { %s75_s23 = scalar_lea.hbm %s126_s1, 128 }
  0x1d   :  { %p76_p13 = scmp.ne.s32.totalorder %s126_s1, %s75_s23  ;;  %p79_p0 = scmp.lt.u32.totalorder %s75_s23, %s126_s1 }
  0x1f   :  { %p81_p1 = pnand %p79_p0, %p76_p13 }
  0x21   :  { %84 = shalt.err (!%p81_p1)
}
  0x22   :  { %33 = dma.vmem_to_hbm [thread:$0]  %s31_s19, 128, %s126_s1, [#allocation4]  }
  0x23   :  { %87 = dma.done.wait [#allocation4], 128  }
  0x24   :  { %88 = vsyncadd [#allocation4], 4294967168 }
  0x25   :  { %37 = vsyncpa [#allocation3], 1 }
  0x26   :  { %38 = vsyncpa [#allocation4], 1 }

</bundles_post_ra>
